<compile_context>
chip_gen: v7x
topology: tpu7x:2x2x1
jax: 0.10.0
libtpu: 0.0.40
codegen_flags: <defaults>
</compile_context>

<pallas_src>
import functools

import jax
import jax.numpy as jnp
from jax.experimental import pallas as pl
from jax.experimental.pallas import tpu as pltpu

TEMPERATURE = 0.07
_NEG = -1e30  # Python float sentinel (never a jnp array -> no captured consts)


def _round_up(x, m):
    return (x + m - 1) // m * m


def _robust_lse_kernel(xr_ref, xc_ref, out_ref, m_scr, l_scr, *,
                       t_r, t_c, b_valid, bp, has_pad):
    """Online logsumexp over the non-diagonal similarity logits of a row tile.

    xr_ref: [T_R, D_pad] bf16  pre-normalized rows, scaled by sqrt(1/T)
    xc_ref: [T_C, D_pad] bf16  pre-normalized columns, scaled by sqrt(1/T)
    out_ref: [T_R, 128] f32    per-row logsumexp, broadcast lane-dense
    """
    r = pl.program_id(0)          # row-tile index    ("parallel")
    c = pl.program_id(1)          # column-tile index ("arbitrary", streamed)

    @pl.when(c == 0)
    def _init():
        m_scr[...] = jnp.full(m_scr.shape, _NEG, dtype=jnp.float32)
        l_scr[...] = jnp.zeros(l_scr.shape, dtype=jnp.float32)

    # sim/T tile = A . B^T, contracting the last dim of both operands
    # (no transpose); bf16 MXU operands, f32 accumulation.
    s = jax.lax.dot_general(
        xr_ref[...], xc_ref[...],
        dimension_numbers=(((1,), (1,)), ((), ())),
        preferred_element_type=jnp.float32)                       # [T_R, T_C]

    row0 = r * t_r
    col0 = c * t_c

    if has_pad:
        # Python-static branch: only traced when padded rows exist.  Padded
        # rows normalize to zero vectors (sim == 0), so they must not
        # contribute to any row's logsumexp.
        j = col0 + jax.lax.broadcasted_iota(jnp.int32, (t_r, t_c), 1)
        invalid = jnp.logical_or(
            jnp.logical_and(j >= b_valid, j < bp),
            j >= bp + b_valid)
        s = jnp.where(invalid, _NEG, s)

    def _accumulate(tile):
        m_prev = m_scr[...]
        m_new = jnp.maximum(m_prev, jnp.max(tile, axis=1, keepdims=True))
        l_scr[...] = (l_scr[...] * jnp.exp(m_prev - m_new)
                      + jnp.sum(jnp.exp(tile - m_new), axis=1, keepdims=True))
        m_scr[...] = m_new

    touches_diag = jnp.logical_and(row0 < col0 + t_c, col0 < row0 + t_r)

    @pl.when(touches_diag)
    def _diag_tile():
        # Single index-difference pattern vs. a scalar: global i == global j
        # iff (j_local - i_local) == (row0 - col0).
        diff = (jax.lax.broadcasted_iota(jnp.int32, (t_r, t_c), 1)
                - jax.lax.broadcasted_iota(jnp.int32, (t_r, t_c), 0))
        _accumulate(jnp.where(diff == row0 - col0, _NEG, s))

    @pl.when(jnp.logical_not(touches_diag))
    def _off_diag_tile():
        _accumulate(s)

    @pl.when(c == pl.num_programs(1) - 1)
    def _finalize():
        lse = m_scr[...] + jnp.log(l_scr[...])                    # [T_R, 1]
        out_ref[...] = jnp.broadcast_to(lse, out_ref.shape)       # lane-dense


def robust_loss(features1, features2, temperature=TEMPERATURE):
    """features1, features2: [B, D]. Returns scalar float32 InfoNCE loss."""
    f1 = jnp.asarray(features1, jnp.float32)
    f2 = jnp.asarray(features2, jnp.float32)
    B, D = f1.shape
    inv_t = 1.0 / float(temperature)

    # ---- wrapper: normalization, positive term (exact f32), bf16 prep ------
    def _normalize(v):
        sq = jnp.sum(v * v, axis=1, keepdims=True)
        return v * jax.lax.rsqrt(jnp.maximum(sq, 1e-24))

    f1n = _normalize(f1)
    f2n = _normalize(f2)
    # Positive logit of row i (and of row i + B): <f1n_i, f2n_i> / T, full f32.
    pos = jnp.sum(f1n * f2n, axis=1) * inv_t                      # [B]

    # ---- tiling --------------------------------------------------------------
    D_pad = _round_up(D, 128)                  # lane-dense feature axis
    T_R = min(512, _round_up(B, 8))            # row tile (one tile per view if small)
    Bp = _round_up(B, T_R)                     # padded rows per view
    N_pad = 2 * Bp
    T_C = N_pad if N_pad <= 1024 else 1024     # multiple of 128 (or full extent)
    R_tiles = N_pad // T_R
    C_tiles = N_pad // T_C
    has_pad = Bp != B
    # Safety note for the -1e30 sentinel: every column tile must contain at
    # least one unmasked real column for every valid row.  Padded runs per
    # view are < T_R <= 512, so with T_C == N_pad or T_C == 1024 a tile can
    # never be fully masked; even if it were, the garbage running sum is
    # flushed to zero by the exp(m_prev - m_new) rescale on the next real tile.

    # Fold sqrt(1/T) into BOTH operands so the kernel's matmul directly yields
    # sim / T; pre-cast to bf16 so the streamed column blocks are half-width.
    scale = float(inv_t) ** 0.5

    def _prep(fn):
        fn = jnp.pad(fn * scale, ((0, Bp - B), (0, D_pad - D)))
        return fn.astype(jnp.bfloat16)

    x = jnp.concatenate([_prep(f1n), _prep(f2n)], axis=0)         # [N_pad, D_pad]

    kernel = functools.partial(_robust_lse_kernel, t_r=T_R, t_c=T_C,
                               b_valid=B, bp=Bp, has_pad=has_pad)

    out = pl.pallas_call(
        kernel,
        out_shape=jax.ShapeDtypeStruct((N_pad, 128), jnp.float32),
        grid=(R_tiles, C_tiles),
        in_specs=[
            pl.BlockSpec((T_R, D_pad), lambda r, c: (r, 0)),      # row block (resident per r)
            pl.BlockSpec((T_C, D_pad), lambda r, c: (c, 0)),      # column block (streamed)
        ],
        out_specs=pl.BlockSpec((T_R, 128), lambda r, c: (r, 0)),
        scratch_shapes=[
            pltpu.VMEM((T_R, 1), jnp.float32),   # running max
            pltpu.VMEM((T_R, 1), jnp.float32),   # running sum
        ],
        compiler_params=pltpu.CompilerParams(
            dimension_semantics=("parallel", "arbitrary"),
            vmem_limit_bytes=48 * 1024 * 1024,
        ),
    )(x, x)

    # Per-row logsumexp of the non-diagonal logits.  Rows belonging to padding
    # hold garbage values; they are excluded by the slicing below.
    lse = out[:, 0]
    loss = (jnp.sum(lse[:B] - pos) + jnp.sum(lse[Bp:Bp + B] - pos)) / (2.0 * B)
    return loss


def _reference(f1, f2, temperature=TEMPERATURE):
    """Pure-JAX reference of the PyTorch module (f32 throughout)."""
    f = jnp.concatenate([f1, f2], axis=0)
    f = f / jnp.maximum(jnp.linalg.norm(f, axis=1, keepdims=True), 1e-12)
    n = f.shape[0]
    b = n // 2
    sim = (f @ f.T) / temperature
    masked = jnp.where(jnp.eye(n, dtype=bool), -jnp.inf, sim)
    lse = jax.scipy.special.logsumexp(masked, axis=1)
    pos = sim[jnp.arange(n), (jnp.arange(n) + b) % n]
    return jnp.mean(lse - pos)


if __name__ == "__main__":
    key = jax.random.PRNGKey(0)
    k1, k2 = jax.random.split(key)
    B, D = 8, 32  # small shapes; N = 2B = 16 rows of the similarity matrix
    features1 = jax.random.normal(k1, (B, D), dtype=jnp.float32)
    features2 = jax.random.normal(k2, (B, D), dtype=jnp.float32)

    loss = robust_loss(features1, features2)
    jax.block_until_ready(loss)

    ref = _reference(features1, features2)
    assert bool(jnp.isfinite(loss)), "loss is not finite"
    # bf16 MXU operands (f32 accumulation) keep the drift well under 0.1.
    assert abs(float(loss) - float(ref)) < 0.1, (float(loss), float(ref))
    print("KERNEL_OK")
</pallas_src>

<mosaic_0001>
module attributes {stable_mosaic.version = 11 : i64} {
  func.func @_robust_lse_kernel(%arg0: i32, %arg1: i32, %arg2: memref<8x128xbf16, #tpu.memory_space<vmem>>, %arg3: memref<16x128xbf16, #tpu.memory_space<vmem>>, %arg4: memref<8x128xf32, #tpu.memory_space<vmem>>, %arg5: memref<8x1xf32, #tpu.memory_space<vmem>>, %arg6: memref<8x1xf32, #tpu.memory_space<vmem>>) attributes {dimension_semantics = [#tpu.dimension_semantics<parallel>, #tpu.dimension_semantics<arbitrary>], iteration_bounds = array<i64: 2, 1>, scalar_prefetch = 0 : i64, scratch_operands = 2 : i64, tpu.core_type = #tpu.core_type<tc>, window_params = [{transform_indices = @transform_0, window_bounds = array<i64: 8, 128>}, {transform_indices = @transform_1, window_bounds = array<i64: 16, 128>}, {transform_indices = @transform_2, window_bounds = array<i64: 8, 128>}]} {
    %c0_i32 = arith.constant 0 : i32
    %0 = arith.cmpi eq, %arg1, %c0_i32 : i32
    %1 = arith.extui %0 : i1 to i32
    %c0_i32_0 = arith.constant 0 : i32
    %2 = arith.cmpi ne, %1, %c0_i32_0 : i32
    scf.if %2 {
      %cst_10 = arith.constant -1.000000e+30 : f32
      %21 = vector.broadcast %cst_10 : f32 to vector<8x1xf32>
      %c0_11 = arith.constant 0 : index
      %c0_12 = arith.constant 0 : index
      %22 = vector.load %arg5[%c0_11, %c0_12] : memref<8x1xf32, #tpu.memory_space<vmem>>, vector<8x1xf32>
      tpu.vector_store %arg5[%c0_11, %c0_12], %21 {strides = array<i32>} : memref<8x1xf32, #tpu.memory_space<vmem>>, vector<8x1xf32>,
      %cst_13 = arith.constant 0.000000e+00 : f32
      %23 = vector.broadcast %cst_13 : f32 to vector<8x1xf32>
      %c0_14 = arith.constant 0 : index
      %c0_15 = arith.constant 0 : index
      %24 = vector.load %arg6[%c0_14, %c0_15] : memref<8x1xf32, #tpu.memory_space<vmem>>, vector<8x1xf32>
      tpu.vector_store %arg6[%c0_14, %c0_15], %23 {strides = array<i32>} : memref<8x1xf32, #tpu.memory_space<vmem>>, vector<8x1xf32>,
    } else {
    }
    %c0 = arith.constant 0 : index
    %c0_1 = arith.constant 0 : index
    %3 = vector.load %arg2[%c0, %c0_1] : memref<8x128xbf16, #tpu.memory_space<vmem>>, vector<8x128xbf16>
    %c0_2 = arith.constant 0 : index
    %c0_3 = arith.constant 0 : index
    %4 = vector.load %arg3[%c0_2, %c0_3] : memref<16x128xbf16, #tpu.memory_space<vmem>>, vector<16x128xbf16>
    %cst = arith.constant dense<0.000000e+00> : vector<8x16xf32>
    %5 = tpu.matmul %3, %4, %cst {dimension_numbers = #tpu.dot_dimension_numbers<[1], [1], [0], [0], [0, 0, 1, 0], [], []>} : vector<8x128xbf16>, vector<16x128xbf16>, vector<8x16xf32> -> vector<8x16xf32>
    %c8_i32 = arith.constant 8 : i32
    %6 = arith.muli %arg0, %c8_i32 : i32
    %c16_i32 = arith.constant 16 : i32
    %7 = arith.muli %arg1, %c16_i32 : i32
    %c16_i32_4 = arith.constant 16 : i32
    %8 = arith.addi %7, %c16_i32_4 : i32
    %9 = arith.cmpi slt, %6, %8 : i32
    %c8_i32_5 = arith.constant 8 : i32
    %10 = arith.addi %6, %c8_i32_5 : i32
    %11 = arith.cmpi slt, %7, %10 : i32
    %12 = arith.andi %9, %11 : i1
    %13 = arith.extui %12 : i1 to i32
    %c0_i32_6 = arith.constant 0 : i32
    %14 = arith.cmpi ne, %13, %c0_i32_6 : i32
    scf.if %14 {
      %21 = tpu.iota {dimensions = array<i32: 1>} : vector<8x16xi32>
      %22 = tpu.iota {dimensions = array<i32: 0>} : vector<8x16xi32>
      %23 = arith.subi %21, %22 : vector<8x16xi32>
      %24 = arith.subi %6, %7 : i32
      %25 = vector.broadcast %24 : i32 to vector<8x16xi32>
      %26 = arith.cmpi eq, %23, %25 : vector<8x16xi32>
      %cst_10 = arith.constant -1.000000e+30 : f32
      %27 = vector.broadcast %cst_10 : f32 to vector<8x16xf32>
      %28 = arith.select %26, %27, %5 : vector<8x16xi1>, vector<8x16xf32>
      %c0_11 = arith.constant 0 : index
      %c0_12 = arith.constant 0 : index
      %29 = vector.load %arg5[%c0_11, %c0_12] : memref<8x1xf32, #tpu.memory_space<vmem>>, vector<8x1xf32>
      %cst_13 = arith.constant dense<0xFF800000> : vector<8xf32>
      %30 = vector.multi_reduction <maximumf>, %28, %cst_13 [1] : vector<8x16xf32> to vector<8xf32>
      %31 = vector.shape_cast %30 : vector<8xf32> to vector<8x1xf32>
      %32 = arith.maximumf %29, %31 : vector<8x1xf32>
      %c0_14 = arith.constant 0 : index
      %c0_15 = arith.constant 0 : index
      %33 = vector.load %arg6[%c0_14, %c0_15] : memref<8x1xf32, #tpu.memory_space<vmem>>, vector<8x1xf32>
      %34 = arith.subf %29, %32 : vector<8x1xf32>
      %35 = math.exp %34 : vector<8x1xf32>
      %36 = arith.mulf %33, %35 : vector<8x1xf32>
      %37 = vector.broadcast %32 : vector<8x1xf32> to vector<8x16xf32>
      %38 = arith.subf %28, %37 : vector<8x16xf32>
      %39 = math.exp %38 : vector<8x16xf32>
      %cst_16 = arith.constant dense<0.000000e+00> : vector<8xf32>
      %40 = vector.multi_reduction <add>, %39, %cst_16 [1] : vector<8x16xf32> to vector<8xf32>
      %41 = vector.shape_cast %40 : vector<8xf32> to vector<8x1xf32>
      %42 = arith.addf %36, %41 : vector<8x1xf32>
      %c0_17 = arith.constant 0 : index
      %c0_18 = arith.constant 0 : index
      %43 = vector.load %arg6[%c0_17, %c0_18] : memref<8x1xf32, #tpu.memory_space<vmem>>, vector<8x1xf32>
      tpu.vector_store %arg6[%c0_17, %c0_18], %42 {strides = array<i32>} : memref<8x1xf32, #tpu.memory_space<vmem>>, vector<8x1xf32>,
      %c0_19 = arith.constant 0 : index
      %c0_20 = arith.constant 0 : index
      %44 = vector.load %arg5[%c0_19, %c0_20] : memref<8x1xf32, #tpu.memory_space<vmem>>, vector<8x1xf32>
      tpu.vector_store %arg5[%c0_19, %c0_20], %32 {strides = array<i32>} : memref<8x1xf32, #tpu.memory_space<vmem>>, vector<8x1xf32>,
    } else {
    }
    %true = arith.constant true
    %15 = arith.xori %12, %true : i1
    %16 = arith.extui %15 : i1 to i32
    %c0_i32_7 = arith.constant 0 : i32
    %17 = arith.cmpi ne, %16, %c0_i32_7 : i32
    scf.if %17 {
      %c0_10 = arith.constant 0 : index
      %c0_11 = arith.constant 0 : index
      %21 = vector.load %arg5[%c0_10, %c0_11] : memref<8x1xf32, #tpu.memory_space<vmem>>, vector<8x1xf32>
      %cst_12 = arith.constant dense<0xFF800000> : vector<8xf32>
      %22 = vector.multi_reduction <maximumf>, %5, %cst_12 [1] : vector<8x16xf32> to vector<8xf32>
      %23 = vector.shape_cast %22 : vector<8xf32> to vector<8x1xf32>
      %24 = arith.maximumf %21, %23 : vector<8x1xf32>
      %c0_13 = arith.constant 0 : index
      %c0_14 = arith.constant 0 : index
      %25 = vector.load %arg6[%c0_13, %c0_14] : memref<8x1xf32, #tpu.memory_space<vmem>>, vector<8x1xf32>
      %26 = arith.subf %21, %24 : vector<8x1xf32>
      %27 = math.exp %26 : vector<8x1xf32>
      %28 = arith.mulf %25, %27 : vector<8x1xf32>
      %29 = vector.broadcast %24 : vector<8x1xf32> to vector<8x16xf32>
      %30 = arith.subf %5, %29 : vector<8x16xf32>
      %31 = math.exp %30 : vector<8x16xf32>
      %cst_15 = arith.constant dense<0.000000e+00> : vector<8xf32>
      %32 = vector.multi_reduction <add>, %31, %cst_15 [1] : vector<8x16xf32> to vector<8xf32>
      %33 = vector.shape_cast %32 : vector<8xf32> to vector<8x1xf32>
      %34 = arith.addf %28, %33 : vector<8x1xf32>
      %c0_16 = arith.constant 0 : index
      %c0_17 = arith.constant 0 : index
      %35 = vector.load %arg6[%c0_16, %c0_17] : memref<8x1xf32, #tpu.memory_space<vmem>>, vector<8x1xf32>
      tpu.vector_store %arg6[%c0_16, %c0_17], %34 {strides = array<i32>} : memref<8x1xf32, #tpu.memory_space<vmem>>, vector<8x1xf32>,
      %c0_18 = arith.constant 0 : index
      %c0_19 = arith.constant 0 : index
      %36 = vector.load %arg5[%c0_18, %c0_19] : memref<8x1xf32, #tpu.memory_space<vmem>>, vector<8x1xf32>
      tpu.vector_store %arg5[%c0_18, %c0_19], %24 {strides = array<i32>} : memref<8x1xf32, #tpu.memory_space<vmem>>, vector<8x1xf32>,
    } else {
    }
    %c0_i32_8 = arith.constant 0 : i32
    %18 = arith.cmpi eq, %arg1, %c0_i32_8 : i32
    %19 = arith.extui %18 : i1 to i32
    %c0_i32_9 = arith.constant 0 : i32
    %20 = arith.cmpi ne, %19, %c0_i32_9 : i32
    scf.if %20 {
      %c0_10 = arith.constant 0 : index
      %c0_11 = arith.constant 0 : index
      %21 = vector.load %arg5[%c0_10, %c0_11] : memref<8x1xf32, #tpu.memory_space<vmem>>, vector<8x1xf32>
      %c0_12 = arith.constant 0 : index
      %c0_13 = arith.constant 0 : index
      %22 = vector.load %arg6[%c0_12, %c0_13] : memref<8x1xf32, #tpu.memory_space<vmem>>, vector<8x1xf32>
      %23 = math.log %22 : vector<8x1xf32>
      %24 = arith.addf %21, %23 : vector<8x1xf32>
      %25 = vector.shape_cast %24 : vector<8x1xf32> to vector<8x1xf32>
      %26 = vector.broadcast %25 : vector<8x1xf32> to vector<8x128xf32>
      %c0_14 = arith.constant 0 : index
      %c0_15 = arith.constant 0 : index
      %27 = vector.load %arg4[%c0_14, %c0_15] : memref<8x128xf32, #tpu.memory_space<vmem>>, vector<8x128xf32>
      tpu.vector_store %arg4[%c0_14, %c0_15], %26 {strides = array<i32>} : memref<8x128xf32, #tpu.memory_space<vmem>>, vector<8x128xf32>,
    } else {
    }
    return
  }
  func.func @transform_0(%arg0: i32, %arg1: i32) -> (i32, i32) {
    %c0_i32 = arith.constant 0 : i32
    %c0_i32_0 = arith.constant 0 : i32
    return %arg0, %c0_i32 : i32, i32
  }
  func.func @transform_1(%arg0: i32, %arg1: i32) -> (i32, i32) {
    %c0_i32 = arith.constant 0 : i32
    %c0_i32_0 = arith.constant 0 : i32
    return %arg1, %c0_i32 : i32, i32
  }
  func.func @transform_2(%arg0: i32, %arg1: i32) -> (i32, i32) {
    %c0_i32 = arith.constant 0 : i32
    %c0_i32_0 = arith.constant 0 : i32
    return %arg0, %c0_i32 : i32, i32
  }
}

</mosaic_0001>

<bundles_post_ra>
// kernel: tpu_custom_call.1
= control target key start
LH: loop header
LB: loop body
LE: loop exit
PB: predicated region body
PF: predicated region fallthrough
CT: control target
= control target key end

     0   :  { %7 = vsyncpa [#allocation5], 0  ;;  %s975_s0 = inlined_call_operand.hbm [shape: bf16[16,128], index: 0, kind: input, shape index: {}]   ;;  %s976_s1 = inlined_call_operand.hbm [shape: bf16[16,128], index: 1, kind: input, shape index: {}]   ;;  %s977_s2 = inlined_call_operand.hbm [shape: f32[16,128], index: 2, kind: output, shape index: {}]  }
   0x1   :  { %9 = vsyncpa [#allocation5 + $0x1], 0 }
   0x2   :  { %10 = vsyncpa [#allocation8], 0 }
   0x3   :  { %11 = vsyncpa [#allocation6], 0 }
   0x4   :  { %13 = vsyncpa [#allocation6 + $0x1], 0  ;;  %s737_s9 = smov 0   ;;  %s739_s10 = smov 0  }
   0x5   :  { %s741_s11 = smov 0   ;;  %s743_s12 = smov 0  }
   0x6   :  { %s745_s13 = smov 0   ;;  %s747_s14 = smov 0  }
   0x7 LB: > { %s444_s15 = sadd.s32 4294967295, %s709_s14   ;;  %s445_s16 = sadd.s32 4294967294, %s709_s14   ;;  %s709_s14 = sphi %s747_s14, %s19_s14   ;;  %s705_s13 = sphi %s745_s13, %s1002_s13   ;;  %s701_s12 = sphi %s743_s12, %s1001_s12   ;;  %s697_s11 = sphi %s741_s11, %s1000_s11   ;;  %s693_s10 = sphi %s739_s10, %s999_s10   ;;  %s689_s9 = sphi %s737_s9, %s998_s9  }
   0x8   : > { %p51_p0 = scmp.ne.s32.totalorder %s693_s10, %s689_s9  ;;  %p771_p1 = scmp.eq.s32.totalorder %s444_s15, 0 }
   0x9   : > { %p775_p2 = scmp.eq.s32.totalorder %s444_s15, 1  ;;  %p107_p3 = scmp.eq.s32.totalorder %s445_s16, 1 }
   0xa   : > { %s982_s17 = scalar_select %p771_p1, 1, 0 }
   0xb   : > { %s983_s18 = scalar_select %p775_p2, 1, 0 }
   0xc   : > { %p781_p4 = por %p771_p1, %p51_p0  ;;  %p446_p5 = scmp.ge.s32.totalorder %s709_s14, 1 }
   0xd   : > { %p786_p6 = por %p107_p3, %p51_p0  ;;  %p114_p7 = scmp.lt.s32.totalorder %s709_s14, 3 }
   0xe   : > { %s984_s19 = scalar_select %p781_p4, 1, 0 }
   0xf   : > { %s985_s20 = scalar_select %p786_p6, 1, 0 }
  0x10   : > { %p791_p8 = pnand %p446_p5, %p114_p7  ;;  %s711_s22 = smov [#allocation7]  }
  0x11   : > { %s129_s23 = sshll.u32 %s711_s22, 4  ;;  %s31_s25 = sadd.s32 1, %s705_s13  ;;  %s130_s23 = int_to_ptr.vmem [resolvable:$true] %s129_s23 }
  0x12   : > { %s986_s21 = scalar_select %p791_p8, 1, 0 }
  0x13   : > { %p478_p9 = pneg %p791_p8  ;;  %s565_s28 = scalar_lea.hbm %s976_s1, 128 }
  0x14   : > { %p566_p12 = scmp.ne.s32.totalorder %s976_s1, %s565_s28  ;;  %p572_p5 = scmp.lt.u32.totalorder %s565_s28, %s976_s1 }
  0x15   : > { %p800_p11 = pnand %p478_p9, %p771_p1 }
  0x17   : > { %p567_p13 = pneg %p800_p11 }
  0x19   : > { %p568_p0 = pnand %p567_p13, %p566_p12 }
  0x1b   : > { %p569_p3 = pneg %p568_p0 }
  0x1d   : > { %p574_p7 = pnand %p572_p5, %p569_p3 }
  0x1f   : > { %577 = shalt.err (!%p574_p7)
}
  0x20   : > { %s578_s5 = scalar_lea.vmem %s130_s23, 128  ;;  %p586_p1 = scmp.lt.s32.totalorder %s130_s23, %s130_s23 }
  0x21   : > { %p579_p9 = scmp.ne.s32.totalorder %s130_s23, %s578_s5  ;;  %p587_p4 = scmp.lt.s32.totalorder %s578_s5, %s578_s5 }
  0x23   : > { %p581_p10 = pnand %p579_p9, %p567_p13  ;;  %p588_p8 = por %p587_p4, %p586_p1 }
  0x25   : > { %p582_p6 = pneg %p581_p10 }
  0x27   : > { %p589_p2 = pnand %p588_p8, %p582_p6 }
  0x29   : > { %592 = shalt.err (!%p589_p2)
}
  0x2a   : > { %s712_s6 = smov 64   ;;  %s713_s7 = smov 4  }
  0x2b   : > { %481 = dma.hbm_to_vmem [thread:$0]  (!%p800_p11), %s976_s1, 128, %s130_s23, [#allocation8], %s712_s6, %s712_s6, %s713_s7  }
  0x2c   : > { %p33_p1 = scmp.ge.s32.totalorder %s31_s25, 2  ;;  %s38_s16 = sadd.s32 1, %s697_s11 }
  0x2d   : > { %p45_p2 = scmp.ne.s32.totalorder %s697_s11, %s693_s10  ;;  %p46_p4 = scmp.eq.s32.totalorder %s709_s14, 0 }
  0x2e   : > { %s1004_s25 = smov (%p33_p1, %s31_s25), 0  ;;  %p989_p8 = scmp.ne.s32.totalorder %s983_s18, 0 }
  0x2f   : > { %p827_p6 = por %p46_p4, %p45_p2  ;;  %s35_s24 = ssub.s32 %s705_s13, %s1004_s25 }
  0x30   : > { %p833_p10 = por %p989_p8, %p45_p2  ;;  %p491_p12 = scmp.lt.s32.totalorder %s709_s14, 2 }
  0x31   : > { %p36_p11 = scmp.eq.s32.totalorder %s35_s24, 0  ;;  %s143_s23 = sand.u32 1, %s697_s11  }
  0x32   : > { %s449_s27 = sshll.u32 %s143_s23, 2  ;;  %s450_s29 = sshll.u32 %s705_s13, 6 }
  0x33   : > { %s842_s28 = scalar_select %p36_p11, %s697_s11, %s38_s16  }
  0x34   : > { %s848_s4 = scalar_lea.hbm %s975_s0, %s450_s29  ;;  %s147_s18 = scalar_lea.vmem [#allocation4], %s449_s27 }
  0x35   : > { %s154_s5 = sshll.u32 %s147_s18, 4  ;;  %p854_p13 = pnand %p491_p12, %p827_p6  ;;  %s850_s5 = int_to_ptr.vmem [resolvable:$true] %s154_s5 }
  0x36   : > { %s144_s7 = scalar_lea.sflag [#allocation5], %s143_s23  ;;  %s593_s8 = scalar_lea.hbm %s848_s4, 64 }
  0x37   : > { %p594_p0 = scmp.ne.s32.totalorder %s848_s4, %s593_s8  ;;  %p595_p3 = pneg %p854_p13 }
  0x38   : > { %s598_s24 = scalar_lea.hbm %s975_s0, 128  ;;  %p599_p9 = scmp.lt.u32.totalorder %s848_s4, %s975_s0 }
  0x39   : > { %p596_p5 = pnand %p595_p3, %p594_p0  ;;  %p600_p1 = scmp.lt.u32.totalorder %s598_s24, %s593_s8 }
  0x3a   : > { %p602_p4 = scmp.lt.u32.totalorder %s593_s8, %s848_s4 }
  0x3b   : > { %p597_p7 = pneg %p596_p5  ;;  %p601_p2 = por %p600_p1, %p599_p9 }
  0x3d   : > { %p603_p6 = por %p602_p4, %p601_p2 }
  0x3f   : > { %p604_p8 = pnand %p603_p6, %p597_p7 }
  0x41   : > { %607 = shalt.err (!%p604_p8)
}
  0x42   : > { %s608_s23 = scalar_lea.vmem %s850_s5, 64  ;;  %s714_s29 = smov [#allocation4]  }
  0x43   : > { %p609_p12 = scmp.ne.s32.totalorder %s850_s5, %s608_s23  ;;  %s613_s30 = sshll.u32 %s714_s29, 4  ;;  %s614_s30 = int_to_ptr.vmem [resolvable:$false] %s613_s30 }
  0x44   : > { %s615_s3 = scalar_lea.vmem %s614_s30, 128  ;;  %p616_p5 = scmp.lt.s32.totalorder %s850_s5, %s614_s30 }
  0x45   : > { %p611_p11 = pnand %p609_p12, %p595_p3  ;;  %p617_p9 = scmp.lt.s32.totalorder %s615_s3, %s608_s23 }
  0x47   : > { %p612_p0 = pneg %p611_p11  ;;  %p618_p1 = por %p617_p9, %p616_p5 }
  0x49   : > { %p619_p2 = pnand %p618_p1, %p612_p0 }
  0x4b   : > { %622 = shalt.err (!%p619_p2)
}
  0x4c   : > { %485 = dma.hbm_to_vmem [thread:$0]  (!%p854_p13), %s848_s4, 64, %s850_s5, %s144_s7  }
  0x4d   : > { %p992_p7 = scmp.ne.s32.totalorder %s986_s21, 0 }
  0x4e   : > { %s886_s18 = sand.u32 (!%p992_p7), 1, %s693_s10   ;;  %p993_p3 = scmp.ne.s32.totalorder (!%p992_p7), %s984_s19, 0 }
  0x4f   : > { %163 = sbr.rel (%p992_p7) target bundleno = 1346 (0x542), region = 28  ;;  %s452_s8 = sshll.u32 (!%p992_p7), %s886_s18, 2 }
  0x50   : > { %s166_s15 = scalar_lea.sflag (!%p992_p7), [#allocation5], %s886_s18  ;;  %s169_s16 = scalar_lea.vmem (!%p992_p7), [#allocation4], %s452_s8 }
  0x56   : > { %676 = dma.done.wait (%p993_p3), %s166_s15, 64  }
  0x57   : > { %678 = vsyncadd (%p993_p3), %s166_s15, 4294967232  ;;  %p994_p4 = scmp.ne.s32.totalorder %s982_s17, 0 }
  0x59   : > { %680 = dma.done.wait (%p994_p4), [#allocation8], 128  }
  0x5a   : > { %682 = vsyncadd (%p994_p4), [#allocation8], 4294967168  ;;  %vm200_vm0 = vcmask 7168   ;;  %s454_s21 = sshll.u32 %s886_s18, 3  ;;  %v715_v0 = vmov -1e+30  }
  0x5b   : > { %201 = vst.msk [vmem:[#allocation2] sm:$0xff] %vm200_vm0, %v715_v0  ;;  %v716_v1 = vmov 0.0   ;;  %vm717_vm1 = vmmov 0   ;;  %v551_v2 = vld [vmem:[#allocation7] sm:$0xff]   ;;  %v203_v3 = vld [vmem:[%s169_s16] sm:$0xf] }
  0x5c   : > { %202 = vst.msk [vmem:[#allocation3] sm:$0xff] %vm200_vm0, %v716_v1  ;;  %464 = vmatprep.subr.bf16.mxu0 %v716_v1  ;;  %466 = vmatprep.mubr.msk.bf16.mxu0 %vm717_vm1, %v716_v1  ;;  %s456_s19 = sshll.u32 %s701_s12, 3  ;;  %s906_s5 = scalar_lea.vmem [#allocation9], %s454_s21 }
  0x5d   : > { %465 = vmatpush3.bf16.xpose.msra.mxu0 %v551_v2  ;;  %s256_s17 = sadd.s32 8, %s456_s19  ;;  %p255_p13 = scmp.lt.s32.totalorder %s456_s19, 16 }
  0x5e   : > { %p457_p6 = scmp.gt.s32.totalorder %s256_s17, 0 }
  0x60   : > { %p902_p8 = pnand %p457_p6, %p255_p13 }
  0x61   : > { %v262_v8 = vlaneseq (!%p902_p8)  ;;  %v268_v11 = vstv (!%p902_p8), %s456_s19  ;;  %vm272_vm2 = vcmask (!%p902_p8), 130048   ;;  %v718_v15 = vmov (!%p902_p8), 0  }
  0x62   : > { %552 = vset.pattern.permute.xlu0 (!%p902_p8), %v718_v15  ;;  %v271_v16 = vld [vmem:[#allocation2] sm:$0xff] (!%p902_p8) }
  0x63   : > { %v263_v9 = vand.u32 (!%p902_p8), 127, %v262_v8  ;;  %v265_v10 = vshrl.u32 (!%p902_p8), %v262_v8, 7  ;;  %v277_v27 = vld [vmem:[#allocation3] sm:$0xff] (!%p902_p8) }
  0x64   : > { %467 = vmatmul.mubr.bf16.vlgmr.msra.gmra.mrb[0].mxu0 %v203_v3 }
  0x65   : > { %v266_v12 = vsub.s32 (!%p902_p8), %v263_v9, %v265_v10 }
  0x67   : > { %vm269_vm3 = vcmp.eq.s32.totalorder (!%p902_p8), %v266_v12, %v268_v11 }
 0x134   : > { %261 = sbr.rel (%p902_p8) target bundleno = 747 (0x2eb), region = 44 }
 0x137   : > { %v246_v4 = vpop.f32.mrb[0].mxu0 }
 0x138   : > { %v468_v5 = vpop.f32.mrb[1].mxu0  ;;  %v270_v13 = vsel (!%p902_p8), %vm269_vm3, -1e+30, %v246_v4 }
 0x139   : > { %v249_v6 = vpop.f32.mrb[2].mxu0  ;;  %v273_v14 = vsel (!%p902_p8), %vm272_vm2, %v270_v13, -inf }
 0x13a   : > { %v469_v7 = vpop.f32.mrb[3].mxu0  ;;  %274 = vmax.xlane.f32.xlu0 (!%p902_p8), %v273_v14 }
 0x1c7   : > { %v275_v17 = vpop.xlane.xlu0 %274 }
 0x1c8   : > { %v276_v18 = vmax.f32 %v271_v16, %v275_v17 }
 0x1ca   : > { %v278_v19 = vsub.f32 %v271_v16, %v276_v18  ;;  %296 = vst.msk [vmem:[#allocation2] sm:$0xff] %vm200_vm0, %v276_v18  ;;  %284 = vperm.xlu0 %552, %v276_v18  }
 0x1cc   : > { %v279_v25 = vmul.f32 1.442695, %v278_v19 }
 0x249   : > { %v285_v20 = vpop.permute.xlu0 %284 }
 0x24a   : > { %v287_v21 = vsub.f32 %v270_v13, %v285_v20 }
 0x24c   : > { %v288_v22 = vmul.f32 1.442695, %v287_v21 }
 0x24e   : > { %553 = vpow2.f32 %v288_v22 }
 0x24f   : > { %555 = vpow2.f32 %v279_v25 }
 0x258   : > { %v554_v23 = vpop.eup %553 }
 0x259   : > { %v290_v24 = vsel %vm272_vm2, %v554_v23, 0.0  ;;  %v556_v26 = vpop.eup %555 }
 0x25a   : > { %291 = vadd.xlane.f32.xlu1 %v290_v24  ;;  %v281_v28 = vmul.f32 %v556_v26, %v277_v27 }
 0x2e7   : > { %v292_v29 = vpop.xlane.xlu1 %291 }
 0x2e8   : > { %v293_v30 = vadd.f32 %v292_v29, %v281_v28 }
 0x2ea   : > { %295 = vst.msk [vmem:[#allocation3] sm:$0xff] %vm200_vm0, %v293_v30 }
 0x2eb PF: > { %299 = sbr.rel (!%p902_p8) target bundleno = 1182 (0x49e), region = 48  ;;  %vm301_vm4 = vcmask (%p902_p8), 130048   ;;  %v719_v32 = vmov (%p902_p8), 0   ;;  %v300_v33 = vld [vmem:[#allocation2] sm:$0xff] (%p902_p8) }
 0x2ec   : > { %v302_v31 = vsel (%p902_p8), %vm301_vm4, %v246_v4, -inf  ;;  %557 = vset.pattern.permute.xlu0 (%p902_p8), %v719_v32 }
 0x2ed   : > { %303 = vmax.xlane.f32.xlu0 (%p902_p8), %v302_v31 }
 0x2f1   : > { %v306_v44 = vld [vmem:[#allocation3] sm:$0xff] (%p902_p8) }
 0x37a   : > { %v304_v34 = vpop.xlane.xlu0 %303 }
 0x37b   : > { %v305_v35 = vmax.f32 %v300_v33, %v304_v34 }
 0x37d   : > { %v307_v36 = vsub.f32 %v300_v33, %v305_v35  ;;  %325 = vst.msk [vmem:[#allocation2] sm:$0xff] %vm200_vm0, %v305_v35  ;;  %313 = vperm.xlu0 %557, %v305_v35  }
 0x37f   : > { %v308_v42 = vmul.f32 1.442695, %v307_v36 }
 0x3fc   : > { %v314_v37 = vpop.permute.xlu0 %313 }
 0x3fd   : > { %v316_v38 = vsub.f32 %v246_v4, %v314_v37 }
 0x3ff   : > { %v317_v39 = vmul.f32 1.442695, %v316_v38 }
 0x401   : > { %558 = vpow2.f32 %v317_v39 }
 0x402   : > { %560 = vpow2.f32 %v308_v42 }
 0x40b   : > { %v559_v40 = vpop.eup %558 }
 0x40c   : > { %v319_v41 = vsel %vm301_vm4, %v559_v40, 0.0  ;;  %v561_v43 = vpop.eup %560 }
 0x40d   : > { %320 = vadd.xlane.f32.xlu1 %v319_v41  ;;  %v310_v45 = vmul.f32 %v561_v43, %v306_v44 }
 0x49a   : > { %v321_v46 = vpop.xlane.xlu1 %320 }
 0x49b   : > { %v322_v47 = vadd.f32 %v321_v46, %v310_v45 }
 0x49d   : > { %324 = vst.msk [vmem:[#allocation3] sm:$0xff] %vm200_vm0, %v322_v47 }
 0x49e PF: > { %v720_v49 = vmov 0   ;;  %v329_v51 = vld [vmem:[#allocation2] sm:$0xff]  ;;  %s459_s6 = sshll.u32 %s701_s12, 7  ;;  %s354_s7 = sshll.u32 %s906_s5, 4  ;;  %s927_s7 = int_to_ptr.vmem [resolvable:$true] %s354_s7 }
 0x49f   : > { %562 = vset.pattern.permute.xlu0 %v720_v49  ;;  %s925_s27 = scalar_lea.hbm %s977_s2, %s459_s6  ;;  %s341_s23 = scalar_lea.sflag [#allocation6], %s886_s18 }
 0x4a0   : > { %s623_s29 = scalar_lea.vmem %s927_s7, 128  ;;  %s721_s12 = smov [#allocation9]  }
 0x4a1   : > { %p624_p12 = scmp.ne.s32.totalorder %s927_s7, %s623_s29  ;;  %s627_s30 = sshll.u32 %s721_s12, 4  ;;  %s628_s30 = int_to_ptr.vmem [resolvable:$false] %s627_s30 }
 0x4a2   : > { %s629_s3 = scalar_lea.vmem %s628_s30, 256  ;;  %p630_p5 = scmp.lt.s32.totalorder %s927_s7, %s628_s30 }
 0x4a3   : > { %p625_p11 = pnand %p624_p12, %p833_p10  ;;  %p631_p9 = scmp.lt.s32.totalorder %s629_s3, %s623_s29 }
 0x4a4   : > { %v330_v48 = vld [vmem:[#allocation3] sm:$0xff] }
 0x4a5   : > { %563 = vlog2.f32 %v330_v48  ;;  %p626_p0 = pneg %p625_p11  ;;  %p632_p1 = por %p631_p9, %p630_p5 }
 0x4a7   : > { %p633_p2 = pnand %p632_p1, %p626_p0 }
 0x4af   : > { %v564_v50 = vpop.eup %563 }
 0x4b0   : > { %v332_v52 = vmul.f32 0.6931472, %v564_v50 }
 0x4b2   : > { %v333_v53 = vadd.f32 %v332_v52, %v329_v51 }
 0x4b4   : > { %336 = vperm.xlu0 %562, %v333_v53  }
 0x533   : > { %v337_v54 = vpop.permute.xlu0 %336 }
 0x534   : > { %339 = vst [vmem:[%s906_s5] sm:$0xff] %v337_v54 }
 0x535   : > { %636 = shalt.err (!%p633_p2)
}
 0x536   : > { %s637_s18 = scalar_lea.hbm %s925_s27, 128  ;;  %s641_s16 = scalar_lea.hbm %s977_s2, 256 }
 0x537   : > { %p638_p7 = scmp.ne.s32.totalorder %s925_s27, %s637_s18  ;;  %p642_p13 = scmp.lt.u32.totalorder %s925_s27, %s977_s2 }
 0x538   : > { %p643_p6 = scmp.lt.u32.totalorder %s641_s16, %s637_s18  ;;  %p645_p12 = scmp.lt.u32.totalorder %s637_s18, %s925_s27 }
 0x539   : > { %p639_p3 = pnand %p638_p7, %p833_p10 }
 0x53a   : > { %p644_p8 = por %p643_p6, %p642_p13 }
 0x53b   : > { %p640_p4 = pneg %p639_p3 }
 0x53c   : > { %p646_p11 = por %p645_p12, %p644_p8 }
 0x53e   : > { %p647_p0 = pnand %p646_p11, %p640_p4 }
 0x540   : > { %650 = shalt.err (!%p647_p0)
}
 0x541   : > { %476 = dma.vmem_to_hbm [thread:$0]  (%p833_p10), %s927_s7, 128, %s925_s27, %s341_s23  }
 0x542 PF: > { %s366_s17 = sand.u32 1, %s689_s9   ;;  %p996_p5 = scmp.ne.s32.totalorder %s985_s20, 0 }
 0x543   : > { %p997_p9 = scmp.ge.s32.totalorder %s709_s14, 2  ;;  %s367_s4 = scalar_lea.sflag [#allocation6], %s366_s17 }
 0x545   : > { %p487_p1 = pnand %p997_p9, %p996_p5 }
 0x547   : > { %684 = dma.done.wait (!%p487_p1), %s367_s4, 128  }
 0x548   : > { %686 = vsyncadd (!%p487_p1), %s367_s4, 4294967168  ;;  %s19_s14 = sadd.s32 1, %s709_s14   ;;  %s998_s9 = smov %s693_s10 }
 0x549   : > { %p16_p2 = scmp.ge.s32.totalorder %s19_s14, 4   ;;  %s999_s10 = smov %s697_s11 }
 0x54a   : > { %s1000_s11 = smov %s842_s28  ;;  %s1001_s12 = smov %s705_s13 }
 0x54b   : > { %s1002_s13 = smov %s1004_s25  ;;  %18 = sbr.rel (!%p16_p2) target bundleno = 7 (0x7), region = 94 }
 0x552   :  { %372 = vsyncpa [#allocation5], 1 }
 0x553   :  { %374 = vsyncpa [#allocation5 + $0x1], 1 }
 0x554   :  { %375 = vsyncpa [#allocation8], 1 }
 0x555   :  { %376 = vsyncpa [#allocation6], 1 }
 0x556   :  { %378 = vsyncpa [#allocation6 + $0x1], 1 }

</bundles_post_ra>
